<compile_context>
chip_gen: v7x
topology: tpu7x:2x2x1
jax: 0.10.0
libtpu: 0.0.40
codegen_flags: <defaults>
</compile_context>

<pallas_src>
from functools import partial

import numpy as np
import jax
import jax.numpy as jnp
from jax.experimental import pallas as pl
from jax.experimental.pallas import tpu as pltpu

# Synthetic stand-ins for pysc2 action ids (no pysc2 dependency).
# TODO(synk): real ids come from pysc2.lib.actions.FUNCTIONS; looked up host-side.
_NO_OP = 0
_SELECT_ARMY = 7
_MOVE_SCREEN = 12
ACTION_DICT = {0: _NO_OP, 1: _SELECT_ARMY, 2: _MOVE_SCREEN}

_LANE = 128       # lane width (last dim)
_SUBLANE_BF16 = 16  # bf16 sublane packing (batch tiles kept multiples of this)
_NEG = -1e30      # large finite negative used instead of -inf


def _round_up(x, m):
    return (x + m - 1) // m * m


def _pad2(a, rows, cols):
    r, c = a.shape
    return jnp.pad(a, ((0, rows - r), (0, cols - c)))


# ----------------------------------------------------------------------------
# Kernel
# ----------------------------------------------------------------------------
def actor_kernel(state_ref, w1_ref, b1_ref, w2_ref, b2_ref, w3_ref,
                 maskb3_ref, out_ref):
    x = state_ref[...]                                               # (TB, OBS) bf16
    # Layer 1: bf16 MXU matmul, f32 accumulate, f32 bias + ReLU.
    h1 = jnp.dot(x, w1_ref[...],
                 preferred_element_type=jnp.float32) + b1_ref[...]   # (1,N) bcast
    h1 = jnp.maximum(h1, 0.0)
    # Layer 2.
    h2 = jnp.dot(h1.astype(jnp.bfloat16), w2_ref[...],
                 preferred_element_type=jnp.float32) + b2_ref[...]
    h2 = jnp.maximum(h2, 0.0)
    # Layer 3 -> logits; the final bias is pre-folded into the additive mask
    # row (0+b3 for available actions, -1e30 for unavailable / padded lanes).
    masked = jnp.dot(h2.astype(jnp.bfloat16), w3_ref[...],
                     preferred_element_type=jnp.float32) + maskb3_ref[...]
    # Numerically-stable log_softmax along the (full 128) lane axis.
    m = jnp.max(masked, axis=-1, keepdims=True)
    lse = jnp.log(jnp.sum(jnp.exp(masked - m), axis=-1, keepdims=True)) + m
    out_ref[...] = masked - lse


# ----------------------------------------------------------------------------
# One-time parameter / mask preparation (hoisted out of the per-call path)
# ----------------------------------------------------------------------------
def prepare_actor(params, mask_bool):
    """Pad & cast weights once, fold b3 into the additive mask row.

    params: dict of (in, out) f32 weights and (1, out) f32 biases.
    mask_bool: length-A bool array, True = action unavailable.
    Returns a dict of device arrays consumed by `actor_forward`.
    """
    obs = params["w1"].shape[0]
    h0 = params["w1"].shape[1]
    h1 = params["w2"].shape[1]
    A = params["w3"].shape[1]

    h0_p = _round_up(h0, _LANE)
    h1_p = _round_up(h1, _LANE)
    a_p = _round_up(A, _LANE)

    # w1 keeps its unpadded K (=obs) axis; only the output lanes are padded.
    w1 = _pad2(params["w1"], obs, h0_p).astype(jnp.bfloat16)
    b1 = _pad2(params["b1"], 1, h0_p).astype(jnp.float32)
    w2 = _pad2(params["w2"], h0_p, h1_p).astype(jnp.bfloat16)
    b2 = _pad2(params["b2"], 1, h1_p).astype(jnp.float32)
    w3 = _pad2(params["w3"], h1_p, a_p).astype(jnp.bfloat16)

    # Additive mask row with b3 folded in: b3 for available actions, -1e30 for
    # unavailable actions and padded lanes (-1e30 absorbs b3 exactly in f32).
    mask_add = jnp.where(jnp.asarray(mask_bool), _NEG, 0.0).astype(jnp.float32)
    maskb3 = jnp.full((1, a_p), _NEG, dtype=jnp.float32)
    maskb3 = maskb3.at[0, :A].set(
        params["b3"].reshape(-1)[:A].astype(jnp.float32) + mask_add)

    prepared = {"w1": w1, "b1": b1, "w2": w2, "b2": b2, "w3": w3,
                "maskb3": maskb3}
    return jax.device_put(prepared)


def _pick_batch_tile(B, batch_tile):
    # Aim for >=4 grid steps (>=2 per v7x TensorCore) but never exceed
    # `batch_tile`; keep the tile a multiple of 16 (bf16 sublane packing).
    tb = _round_up(max(1, -(-B // 4)), _SUBLANE_BF16)
    tb = max(_SUBLANE_BF16, min(tb, batch_tile))
    return tb


# ----------------------------------------------------------------------------
# Forward pass
# ----------------------------------------------------------------------------
@partial(jax.jit, static_argnames=("batch_tile",))
def actor_forward(state, prepared, *, batch_tile=2048):
    """state: (B, obs) float; prepared: output of `prepare_actor`.

    Returns the padded (b_pad, 128) f32 log-prob slab; rows [:B] and lanes [:A]
    hold the real log-probs (padded lanes are huge-negative).  Keeping the
    lane-dense output avoids a post-kernel gather; slice only if needed.
    """
    B, obs = state.shape
    a_p = prepared["maskb3"].shape[1]

    tb = _pick_batch_tile(B, batch_tile)
    b_pad = _round_up(B, tb)

    # State goes to the kernel as bf16 with its natural (unpadded) obs lane.
    state_bf = state.astype(jnp.bfloat16)
    if b_pad != B:
        state_bf = jnp.pad(state_bf, ((0, b_pad - B), (0, 0)))

    def resident(shape):
        nd = len(shape)
        return pl.BlockSpec(shape, lambda i, _nd=nd: (0,) * _nd)

    out = pl.pallas_call(
        actor_kernel,
        out_shape=jax.ShapeDtypeStruct((b_pad, a_p), jnp.float32),
        grid_spec=pl.GridSpec(
            grid=(b_pad // tb,),
            in_specs=[
                pl.BlockSpec((tb, obs), lambda i: (i, 0)),   # state: tiled on batch
                resident(prepared["w1"].shape), resident(prepared["b1"].shape),
                resident(prepared["w2"].shape), resident(prepared["b2"].shape),
                resident(prepared["w3"].shape),
                resident(prepared["maskb3"].shape),
            ],
            out_specs=pl.BlockSpec((tb, a_p), lambda i: (i, 0)),
        ),
        compiler_params=pltpu.CompilerParams(
            dimension_semantics=("parallel",)),   # shard batch across v7x TCs
    )(state_bf, prepared["w1"], prepared["b1"], prepared["w2"],
      prepared["b2"], prepared["w3"], prepared["maskb3"])

    return out


def actor_log_probs(state, prepared, action_space, *, batch_tile=2048):
    """Convenience wrapper matching the PyTorch forward signature: (B, A)."""
    out = actor_forward(state, prepared, batch_tile=batch_tile)
    return out[:state.shape[0], :action_space]


# ----------------------------------------------------------------------------
# Init / mask helpers (host-side, one-time)
# ----------------------------------------------------------------------------
def init_params(key, observation_space, action_space, hiddens=(64, 32)):
    """Deterministic synthetic init. Weights stored as (in, out), f32."""
    dims = [observation_space, *hiddens, action_space]
    params = {}
    for li in range(3):
        key, kw, kb = jax.random.split(key, 3)
        fan_in, fan_out = dims[li], dims[li + 1]
        bound = 1.0 / np.sqrt(fan_in)  # PyTorch Linear default init range
        params[f"w{li+1}"] = jax.random.uniform(
            kw, (fan_in, fan_out), jnp.float32, -bound, bound)
        params[f"b{li+1}"] = jax.random.uniform(
            kb, (1, fan_out), jnp.float32, -bound, bound)
    return params


def get_action_mask(available_actions, action_space):
    # True where the action is NOT available (matches PyTorch get_action_mask).
    return ~np.array([ACTION_DICT[i] in available_actions
                      for i in range(action_space)])


# ----------------------------------------------------------------------------
# References
# ----------------------------------------------------------------------------
def _reference(state, params, mask_bool):
    """Pure-JAX reference mirroring the kernel math (bf16 MXU inputs, f32
    accumulate, additive -1e30 mask)."""
    bf = jnp.bfloat16
    h1 = jnp.maximum(
        jnp.dot(state.astype(bf), params["w1"].astype(bf),
                preferred_element_type=jnp.float32) + params["b1"], 0.0)
    h2 = jnp.maximum(
        jnp.dot(h1.astype(bf), params["w2"].astype(bf),
                preferred_element_type=jnp.float32) + params["b2"], 0.0)
    logits = jnp.dot(h2.astype(bf), params["w3"].astype(bf),
                     preferred_element_type=jnp.float32) + params["b3"]
    add = jnp.where(jnp.asarray(mask_bool), _NEG, 0.0).astype(jnp.float32)
    return jax.nn.log_softmax(logits + add[None, :], axis=-1)


def _reference_f32(state, params, mask_bool):
    """Full-precision reference of the original PyTorch semantics."""
    h1 = jnp.maximum(state @ params["w1"] + params["b1"], 0.0)
    h2 = jnp.maximum(h1 @ params["w2"] + params["b2"], 0.0)
    logits = h2 @ params["w3"] + params["b3"]
    logits = jnp.where(jnp.asarray(mask_bool)[None, :], -jnp.inf, logits)
    return jax.nn.log_softmax(logits, axis=-1)


# ----------------------------------------------------------------------------
if __name__ == "__main__":
    key = jax.random.PRNGKey(0)
    observation_space = 32
    action_space = 3
    hiddens = (64, 32)

    k_state, k_params, k_state2 = jax.random.split(key, 3)
    params = init_params(k_params, observation_space, action_space, hiddens)

    # Only no_op and select_army available; Attack_screen is masked out.
    available_actions = [_NO_OP, _SELECT_ARMY]
    mask_bool = get_action_mask(available_actions, action_space)

    # One-time prep (padding, bf16 casts, b3 folded into the mask row).
    prepared = prepare_actor(params, mask_bool)

    # --- small batch (B=2), single grid step ---
    state = jax.random.normal(k_state, (2, observation_space), jnp.float32)
    log_probs = actor_log_probs(state, prepared, action_space)
    jax.block_until_ready(log_probs)

    ref = _reference(state, params, mask_bool)
    np.testing.assert_allclose(np.asarray(log_probs), np.asarray(ref),
                               rtol=1e-3, atol=1e-3)
    # Semantic check vs the full-f32 PyTorch-style path (available actions only,
    # since the f32 reference uses true -inf for masked entries).
    ref32 = _reference_f32(state, params, mask_bool)
    avail = np.where(~mask_bool)[0]
    np.testing.assert_allclose(np.asarray(log_probs)[:, avail],
                               np.asarray(ref32)[:, avail],
                               rtol=0, atol=5e-2)

    # --- larger batch exercising the tiled (multi-step, padded) grid ---
    state_big = jax.random.normal(k_state2, (520, observation_space), jnp.float32)
    log_probs_big = actor_log_probs(state_big, prepared, action_space)
    jax.block_until_ready(log_probs_big)
    ref_big = _reference(state_big, params, mask_bool)
    np.testing.assert_allclose(np.asarray(log_probs_big), np.asarray(ref_big),
                               rtol=1e-3, atol=1e-3)

    print("KERNEL_OK")
</pallas_src>

<mosaic_0001>
module attributes {stable_mosaic.version = 11 : i64} {
  func.func @actor_kernel(%arg0: i32, %arg1: memref<16x32xbf16, #tpu.memory_space<vmem>>, %arg2: memref<32x128xbf16, #tpu.memory_space<vmem>>, %arg3: memref<1x128xf32, #tpu.memory_space<vmem>>, %arg4: memref<128x128xbf16, #tpu.memory_space<vmem>>, %arg5: memref<1x128xf32, #tpu.memory_space<vmem>>, %arg6: memref<128x128xbf16, #tpu.memory_space<vmem>>, %arg7: memref<1x128xf32, #tpu.memory_space<vmem>>, %arg8: memref<16x128xf32, #tpu.memory_space<vmem>>) attributes {dimension_semantics = [#tpu.dimension_semantics<parallel>], iteration_bounds = array<i64: 1>, scalar_prefetch = 0 : i64, scratch_operands = 0 : i64, tpu.core_type = #tpu.core_type<tc>, window_params = [{transform_indices = @transform_0, window_bounds = array<i64: 16, 32>}, {pipeline_mode = #tpu.pipeline_mode<synchronous>, transform_indices = @transform_1, window_bounds = array<i64: 32, 128>}, {pipeline_mode = #tpu.pipeline_mode<synchronous>, transform_indices = @transform_2, window_bounds = array<i64: 1, 128>}, {pipeline_mode = #tpu.pipeline_mode<synchronous>, transform_indices = @transform_3, window_bounds = array<i64: 128, 128>}, {pipeline_mode = #tpu.pipeline_mode<synchronous>, transform_indices = @transform_4, window_bounds = array<i64: 1, 128>}, {pipeline_mode = #tpu.pipeline_mode<synchronous>, transform_indices = @transform_5, window_bounds = array<i64: 128, 128>}, {pipeline_mode = #tpu.pipeline_mode<synchronous>, transform_indices = @transform_6, window_bounds = array<i64: 1, 128>}, {transform_indices = @transform_7, window_bounds = array<i64: 16, 128>}]} {
    %c0 = arith.constant 0 : index
    %c0_0 = arith.constant 0 : index
    %0 = vector.load %arg1[%c0, %c0_0] : memref<16x32xbf16, #tpu.memory_space<vmem>>, vector<16x32xbf16>
    %c0_1 = arith.constant 0 : index
    %c0_2 = arith.constant 0 : index
    %1 = vector.load %arg2[%c0_1, %c0_2] : memref<32x128xbf16, #tpu.memory_space<vmem>>, vector<32x128xbf16>
    %cst = arith.constant dense<0.000000e+00> : vector<16x128xf32>
    %2 = tpu.matmul %0, %1, %cst {dimension_numbers = #tpu.dot_dimension_numbers<[1], [0], [0], [1], [0, 0, 1, 1], [], []>} : vector<16x32xbf16>, vector<32x128xbf16>, vector<16x128xf32> -> vector<16x128xf32>
    %c0_3 = arith.constant 0 : index
    %c0_4 = arith.constant 0 : index
    %3 = vector.load %arg3[%c0_3, %c0_4] : memref<1x128xf32, #tpu.memory_space<vmem>>, vector<1x128xf32>
    %4 = vector.broadcast %3 : vector<1x128xf32> to vector<16x128xf32>
    %5 = arith.addf %2, %4 : vector<16x128xf32>
    %cst_5 = arith.constant 0.000000e+00 : f32
    %6 = vector.broadcast %cst_5 : f32 to vector<16x128xf32>
    %7 = arith.maximumf %5, %6 : vector<16x128xf32>
    %8 = arith.truncf %7 : vector<16x128xf32> to vector<16x128xbf16>
    %c0_6 = arith.constant 0 : index
    %c0_7 = arith.constant 0 : index
    %9 = vector.load %arg4[%c0_6, %c0_7] : memref<128x128xbf16, #tpu.memory_space<vmem>>, vector<128x128xbf16>
    %cst_8 = arith.constant dense<0.000000e+00> : vector<16x128xf32>
    %10 = tpu.matmul %8, %9, %cst_8 {dimension_numbers = #tpu.dot_dimension_numbers<[1], [0], [0], [1], [0, 0, 1, 1], [], []>} : vector<16x128xbf16>, vector<128x128xbf16>, vector<16x128xf32> -> vector<16x128xf32>
    %c0_9 = arith.constant 0 : index
    %c0_10 = arith.constant 0 : index
    %11 = vector.load %arg5[%c0_9, %c0_10] : memref<1x128xf32, #tpu.memory_space<vmem>>, vector<1x128xf32>
    %12 = vector.broadcast %11 : vector<1x128xf32> to vector<16x128xf32>
    %13 = arith.addf %10, %12 : vector<16x128xf32>
    %cst_11 = arith.constant 0.000000e+00 : f32
    %14 = vector.broadcast %cst_11 : f32 to vector<16x128xf32>
    %15 = arith.maximumf %13, %14 : vector<16x128xf32>
    %16 = arith.truncf %15 : vector<16x128xf32> to vector<16x128xbf16>
    %c0_12 = arith.constant 0 : index
    %c0_13 = arith.constant 0 : index
    %17 = vector.load %arg6[%c0_12, %c0_13] : memref<128x128xbf16, #tpu.memory_space<vmem>>, vector<128x128xbf16>
    %cst_14 = arith.constant dense<0.000000e+00> : vector<16x128xf32>
    %18 = tpu.matmul %16, %17, %cst_14 {dimension_numbers = #tpu.dot_dimension_numbers<[1], [0], [0], [1], [0, 0, 1, 1], [], []>} : vector<16x128xbf16>, vector<128x128xbf16>, vector<16x128xf32> -> vector<16x128xf32>
    %c0_15 = arith.constant 0 : index
    %c0_16 = arith.constant 0 : index
    %19 = vector.load %arg7[%c0_15, %c0_16] : memref<1x128xf32, #tpu.memory_space<vmem>>, vector<1x128xf32>
    %20 = vector.broadcast %19 : vector<1x128xf32> to vector<16x128xf32>
    %21 = arith.addf %18, %20 : vector<16x128xf32>
    %cst_17 = arith.constant dense<0xFF800000> : vector<16xf32>
    %22 = vector.multi_reduction <maximumf>, %21, %cst_17 [1] : vector<16x128xf32> to vector<16xf32>
    %23 = vector.shape_cast %22 : vector<16xf32> to vector<16x1xf32>
    %24 = vector.broadcast %23 : vector<16x1xf32> to vector<16x128xf32>
    %25 = arith.subf %21, %24 : vector<16x128xf32>
    %26 = math.exp %25 : vector<16x128xf32>
    %cst_18 = arith.constant dense<0.000000e+00> : vector<16xf32>
    %27 = vector.multi_reduction <add>, %26, %cst_18 [1] : vector<16x128xf32> to vector<16xf32>
    %28 = vector.shape_cast %27 : vector<16xf32> to vector<16x1xf32>
    %29 = math.log %28 : vector<16x1xf32>
    %30 = arith.addf %29, %23 : vector<16x1xf32>
    %31 = vector.broadcast %30 : vector<16x1xf32> to vector<16x128xf32>
    %32 = arith.subf %21, %31 : vector<16x128xf32>
    %c0_19 = arith.constant 0 : index
    %c0_20 = arith.constant 0 : index
    %33 = vector.load %arg8[%c0_19, %c0_20] : memref<16x128xf32, #tpu.memory_space<vmem>>, vector<16x128xf32>
    tpu.vector_store %arg8[%c0_19, %c0_20], %32 {strides = array<i32>} : memref<16x128xf32, #tpu.memory_space<vmem>>, vector<16x128xf32>,
    return
  }
  func.func @transform_0(%arg0: i32) -> (i32, i32) {
    %c0_i32 = arith.constant 0 : i32
    %c0_i32_0 = arith.constant 0 : i32
    return %arg0, %c0_i32 : i32, i32
  }
  func.func @transform_1(%arg0: i32) -> (i32, i32) {
    %c0_i32 = arith.constant 0 : i32
    %c0_i32_0 = arith.constant 0 : i32
    %c0_i32_1 = arith.constant 0 : i32
    return %c0_i32, %c0_i32_0 : i32, i32
  }
  func.func @transform_2(%arg0: i32) -> (i32, i32) {
    %c0_i32 = arith.constant 0 : i32
    %c0_i32_0 = arith.constant 0 : i32
    %c0_i32_1 = arith.constant 0 : i32
    return %c0_i32, %c0_i32_0 : i32, i32
  }
  func.func @transform_3(%arg0: i32) -> (i32, i32) {
    %c0_i32 = arith.constant 0 : i32
    %c0_i32_0 = arith.constant 0 : i32
    %c0_i32_1 = arith.constant 0 : i32
    return %c0_i32, %c0_i32_0 : i32, i32
  }
  func.func @transform_4(%arg0: i32) -> (i32, i32) {
    %c0_i32 = arith.constant 0 : i32
    %c0_i32_0 = arith.constant 0 : i32
    %c0_i32_1 = arith.constant 0 : i32
    return %c0_i32, %c0_i32_0 : i32, i32
  }
  func.func @transform_5(%arg0: i32) -> (i32, i32) {
    %c0_i32 = arith.constant 0 : i32
    %c0_i32_0 = arith.constant 0 : i32
    %c0_i32_1 = arith.constant 0 : i32
    return %c0_i32, %c0_i32_0 : i32, i32
  }
  func.func @transform_6(%arg0: i32) -> (i32, i32) {
    %c0_i32 = arith.constant 0 : i32
    %c0_i32_0 = arith.constant 0 : i32
    %c0_i32_1 = arith.constant 0 : i32
    return %c0_i32, %c0_i32_0 : i32, i32
  }
  func.func @transform_7(%arg0: i32) -> (i32, i32) {
    %c0_i32 = arith.constant 0 : i32
    %c0_i32_0 = arith.constant 0 : i32
    return %arg0, %c0_i32 : i32, i32
  }
}

</mosaic_0001>

<bundles_post_ra>
// kernel: actor_forward.1
= control target key start
LH: loop header
LB: loop body
LE: loop exit
PB: predicated region body
PF: predicated region fallthrough
CT: control target
= control target key end

     0   :  { %12 = vsyncpa [#allocation3], 0  ;;  %s730_s0 = inlined_call_operand.vmem [shape: bf16[16,32], index: 0, kind: input, shape index: {}]   ;;  %s731_s1 = inlined_call_operand.vmem [shape: bf16[32,128], index: 1, kind: input, shape index: {}]   ;;  %s732_s2 = inlined_call_operand.vmem [shape: f32[1,128], index: 2, kind: input, shape index: {}]   ;;  %s733_s3 = inlined_call_operand.hbm [shape: bf16[128,128], index: 3, kind: input, shape index: {}]   ;;  %s734_s4 = inlined_call_operand.vmem [shape: f32[1,128], index: 4, kind: input, shape index: {}]   ;;  %s735_s5 = inlined_call_operand.hbm [shape: bf16[128,128], index: 5, kind: input, shape index: {}]   ;;  %s736_s6 = inlined_call_operand.vmem [shape: f32[1,128], index: 6, kind: input, shape index: {}]   ;;  %s737_s7 = inlined_call_operand.hbm [shape: f32[16,128], index: 7, kind: output, shape index: {}]  }
   0x1   :  { %13 = vsyncpa [#allocation6], 0 }
   0x2   :  { %14 = vsyncpa [#allocation4], 0  ;;  %s603_s24 = smov [#allocation2]   ;;  %s531_s28 = scalar_lea.hbm %s733_s3, 1024 }
   0x3   :  { %s26_s25 = sshll.u32 %s603_s24, 4  ;;  %p532_p0 = scmp.ne.s32.totalorder %s733_s3, %s531_s28  ;;  %s27_s25 = int_to_ptr.vmem [resolvable:$true] %s26_s25 }
   0x4   :  { %p535_p1 = scmp.lt.u32.totalorder %s531_s28, %s733_s3 }
   0x6   :  { %p537_p2 = pnand %p535_p1, %p532_p0 }
   0x8   :  { %540 = shalt.err (!%p537_p2)
}
   0x9   :  { %s541_s10 = scalar_lea.vmem %s27_s25, 1024  ;;  %p546_p4 = scmp.lt.s32.totalorder %s27_s25, %s27_s25 }
   0xa   :  { %p542_p3 = scmp.ne.s32.totalorder %s27_s25, %s541_s10  ;;  %p547_p5 = scmp.lt.s32.totalorder %s541_s10, %s541_s10 }
   0xc   :  { %p548_p6 = por %p547_p5, %p546_p4 }
   0xe   :  { %p549_p7 = pnand %p548_p6, %p542_p3 }
  0x10   :  { %552 = shalt.err (!%p549_p7)
}
  0x11   :  { %s604_s11 = smov 64   ;;  %s605_s12 = smov 4  }
  0x12   :  { %32 = dma.hbm_to_vmem [thread:$0]  %s733_s3, 1024, %s27_s25, [#allocation3], %s604_s11, %s604_s11, %s605_s12  }
  0x13   :  { %s606_s15 = smov [#allocation5]   ;;  %s553_s19 = scalar_lea.hbm %s735_s5, 1024 }
  0x14   :  { %s40_s16 = sshll.u32 %s606_s15, 4  ;;  %p554_p8 = scmp.ne.s32.totalorder %s735_s5, %s553_s19  ;;  %s41_s16 = int_to_ptr.vmem [resolvable:$true] %s40_s16 }
  0x15   :  { %p557_p9 = scmp.lt.u32.totalorder %s553_s19, %s735_s5 }
  0x17   :  { %p559_p10 = pnand %p557_p9, %p554_p8 }
  0x19   :  { %562 = shalt.err (!%p559_p10)
}
  0x1a   :  { %s563_s24 = scalar_lea.vmem %s41_s16, 1024  ;;  %p568_p12 = scmp.lt.s32.totalorder %s41_s16, %s41_s16 }
  0x1b   :  { %p564_p11 = scmp.ne.s32.totalorder %s41_s16, %s563_s24  ;;  %p569_p13 = scmp.lt.s32.totalorder %s563_s24, %s563_s24 }
  0x1d   :  { %p570_p0 = por %p569_p13, %p568_p12 }
  0x1f   :  { %p571_p1 = pnand %p570_p0, %p564_p11 }
  0x21   :  { %574 = shalt.err (!%p571_p1)
}
  0x22   :  { %46 = dma.hbm_to_vmem [thread:$0]  %s735_s5, 1024, %s41_s16, [#allocation6], %s604_s11, %s604_s11, %s605_s12  }
  0x23   :  { %597 = dma.done.wait [#allocation3], 1024  }
  0x24   :  { %598 = vsyncadd [#allocation3], 4294966272 }
  0x25   :  { %599 = dma.done.wait [#allocation6], 1024  }
  0x26   :  { %600 = vsyncadd [#allocation6], 4294966272  ;;  %v607_v0 = vmov 0.0   ;;  %vm608_vm0 = vmmov 0   ;;  %v504_v1 = vld [vmem:[%s731_s1] sm:$0xff]   ;;  %v505_v2 = vld [vmem:[%s731_s1 + $0x8] sm:$0xff]  }
  0x27   :  { %447 = vmatprep.subr.bf16.mxu0 %v607_v0  ;;  %451 = vmatprep.mubr.msk.bf16.mxu0 %vm608_vm0, %v607_v0  ;;  %v507_v3 = vld [vmem:[#allocation2] sm:$0xff]   ;;  %v506_v4 = vld [vmem:[%s730_s0] sm:$0xff]   ;;  %v508_v5 = vld [vmem:[#allocation2 + $0x8] sm:$0xff]   ;;  %vm86_vm1 = vcmask 261120  }
  0x28   :  { %455 = vmatprep.subr.bf16.mxu1 %v607_v0  ;;  %471 = vmatprep.mubr.msk.bf16.mxu1 %vm608_vm0, %v607_v0  ;;  %v509_v6 = vld [vmem:[#allocation2 + $0x10] sm:$0xff]   ;;  %v510_v7 = vld [vmem:[#allocation2 + $0x18] sm:$0xff]   ;;  %v511_v8 = vld [vmem:[#allocation2 + $0x20] sm:$0xff]  }
  0x29   :  { %448 = vmatpush3.bf16.msra.mxu0 %v504_v1  ;;  %456 = vmatpush3.bf16.msra.mxu1 %v507_v3  ;;  %v512_v9 = vld [vmem:[#allocation2 + $0x28] sm:$0xff]   ;;  %v513_v10 = vld [vmem:[#allocation2 + $0x30] sm:$0xff]   ;;  %v514_v11 = vld [vmem:[#allocation2 + $0x38] sm:$0xff]  }
  0x2a   :  { %449 = vmatprep.subr.bf16.mxu0 %v607_v0  ;;  %457 = vmatprep.subr.bf16.mxu1 %v607_v0  ;;  %v515_v12 = vld [vmem:[#allocation5] sm:$0xff]   ;;  %v516_v13 = vld [vmem:[#allocation5 + $0x8] sm:$0xff]   ;;  %v517_v14 = vld [vmem:[#allocation5 + $0x10] sm:$0xff]  }
  0x2b   :  { %v518_v15 = vld [vmem:[#allocation5 + $0x18] sm:$0xff]   ;;  %v519_v16 = vld [vmem:[#allocation5 + $0x20] sm:$0xff]   ;;  %v520_v17 = vld [vmem:[#allocation5 + $0x28] sm:$0xff]  }
  0x2c   :  { %v403_v18 = vld [vmem:[%s732_s2] ss:$0 sm:$0xff]  ;;  %v522_v29 = vld [vmem:[#allocation5 + $0x38] sm:$0xff]  }
  0x2d   :  { %450 = vmatpush3.bf16.msra.mxu0 %v505_v2  ;;  %458 = vmatpush3.bf16.msra.mxu1 %v508_v5  ;;  %v521_v28 = vld [vmem:[#allocation5 + $0x30] sm:$0xff]  }
  0x2e   :  { %475 = vmatprep.subr.bf16.mxu0 %v607_v0  ;;  %459 = vmatprep.subr.bf16.mxu1 %v607_v0  ;;  %v408_v30 = vld [vmem:[%s734_s4] ss:$0 sm:$0xff]  ;;  %s609_s4 = smov [#allocation7]  }
  0x2f   :  { %v417_v40 = vld [vmem:[%s736_s6] ss:$0 sm:$0xff]  ;;  %s390_s6 = sshll.u32 %s609_s4, 4  ;;  %s391_s6 = int_to_ptr.vmem [resolvable:$true] %s390_s6 }
  0x30   :  { %452 = vmatmul.mubr.msk.bf16.vlgmr.msra.gmra.mrb[0].mxu0 %vm86_vm1, %v506_v4  ;;  %s575_s11 = scalar_lea.vmem %s391_s6, 256  ;;  %p580_p3 = scmp.lt.s32.totalorder %s391_s6, %s391_s6 }
  0x31   :  { %491 = vmatprep.mubr.msk.bf16.mxu0 %vm608_vm0, %v607_v0  ;;  %460 = vmatpush3.bf16.msra.mxu1 %v509_v6  ;;  %p576_p2 = scmp.ne.s32.totalorder %s391_s6, %s575_s11  ;;  %p581_p4 = scmp.lt.s32.totalorder %s575_s11, %s575_s11 }
  0x32   :  { %461 = vmatprep.subr.bf16.mxu1 %v607_v0  ;;  %476 = vmatpush3.bf16.msra.mxu0 %v515_v12 }
  0x33   :  { %477 = vmatprep.subr.bf16.mxu0 %v607_v0  ;;  %p582_p5 = por %p581_p4, %p580_p3 }
  0x35   :  { %462 = vmatpush3.bf16.msra.mxu1 %v510_v7  ;;  %p583_p6 = pnand %p582_p5, %p576_p2 }
  0x36   :  { %463 = vmatprep.subr.bf16.mxu1 %v607_v0  ;;  %478 = vmatpush3.bf16.msra.mxu0 %v516_v13 }
  0x37   :  { %479 = vmatprep.subr.bf16.mxu0 %v607_v0 }
  0x39   :  { %464 = vmatpush3.bf16.msra.mxu1 %v511_v8 }
  0x3a   :  { %465 = vmatprep.subr.bf16.mxu1 %v607_v0  ;;  %480 = vmatpush3.bf16.msra.mxu0 %v517_v14 }
  0x3b   :  { %481 = vmatprep.subr.bf16.mxu0 %v607_v0 }
  0x3d   :  { %466 = vmatpush3.bf16.msra.mxu1 %v512_v9 }
  0x3e   :  { %467 = vmatprep.subr.bf16.mxu1 %v607_v0  ;;  %482 = vmatpush3.bf16.msra.mxu0 %v518_v15 }
  0x3f   :  { %483 = vmatprep.subr.bf16.mxu0 %v607_v0 }
  0x41   :  { %468 = vmatpush3.bf16.msra.mxu1 %v513_v10 }
  0x42   :  { %469 = vmatprep.subr.bf16.mxu1 %v607_v0  ;;  %484 = vmatpush3.bf16.msra.mxu0 %v519_v16 }
  0x43   :  { %485 = vmatprep.subr.bf16.mxu0 %v607_v0 }
  0x45   :  { %470 = vmatpush3.bf16.msra.mxu1 %v514_v11 }
  0x46   :  { %486 = vmatpush3.bf16.msra.mxu0 %v520_v17 }
  0x47   :  { %487 = vmatprep.subr.bf16.mxu0 %v607_v0 }
  0x4a   :  { %488 = vmatpush3.bf16.msra.mxu0 %v521_v28 }
  0x4b   :  { %489 = vmatprep.subr.bf16.mxu0 %v607_v0 }
  0x4e   :  { %490 = vmatpush3.bf16.msra.mxu0 %v522_v29 }
 0x103   :  { %v124_v19 = vpop.f32.mrb[0].mxu0 }
 0x104   :  { %v125_v20 = vadd.f32 %v403_v18, %v124_v19  ;;  %v453_v21 = vpop.f32.mrb[1].mxu0 }
 0x105   :  { %v127_v22 = vpop.f32.mrb[2].mxu0 }
 0x106   :  { %v128_v23 = vadd.f32 %v403_v18, %v127_v22  ;;  %v454_v24 = vpop.f32.mrb[3].mxu0  ;;  %v131_v25 = vmax.f32 %v125_v20, 0.0 }
 0x108   :  { %v132_v26 = vmax.f32 %v128_v23, 0.0 }
 0x10a   :  { %v133_v27 = vpack.c.bf16 %v132_v26, %v131_v25 }
 0x10c   :  { %472 = vmatmul.mubr.bf16.vlgmr.msra.gmra.mrb[0].mxu1 %v133_v27 }
 0x1df   :  { %v239_v31 = vpop.f32.mrb[0].mxu1 }
 0x1e0   :  { %v240_v32 = vadd.f32 %v408_v30, %v239_v31  ;;  %v473_v33 = vpop.f32.mrb[1].mxu1 }
 0x1e1   :  { %v242_v34 = vpop.f32.mrb[2].mxu1 }
 0x1e2   :  { %v243_v35 = vadd.f32 %v408_v30, %v242_v34  ;;  %v474_v36 = vpop.f32.mrb[3].mxu1  ;;  %v246_v37 = vmax.f32 %v240_v32, 0.0 }
 0x1e4   :  { %v247_v38 = vmax.f32 %v243_v35, 0.0 }
 0x1e6   :  { %v248_v39 = vpack.c.bf16 %v247_v38, %v246_v37 }
 0x1e8   :  { %492 = vmatmul.mubr.bf16.vlgmr.msra.gmra.mrb[4].mxu0 %v248_v39 }
 0x2bb   :  { %v354_v41 = vpop.f32.mrb[4].mxu0 }
 0x2bc   :  { %v355_v42 = vadd.f32 %v417_v40, %v354_v41  ;;  %v493_v43 = vpop.f32.mrb[5].mxu0 }
 0x2bd   :  { %v357_v44 = vpop.f32.mrb[6].mxu0 }
 0x2be   :  { %361 = vmax.xlane.f32.xlu0 %v355_v42  ;;  %v494_v45 = vpop.f32.mrb[7].mxu0  ;;  %v358_v46 = vadd.f32 %v417_v40, %v357_v44 }
 0x2c2   :  { %363 = vmax.xlane.f32.xlu0 %v358_v46 }
 0x34b   :  { %v362_v47 = vpop.xlane.xlu0 %361 }
 0x34c   :  { %v365_v48 = vsub.f32 %v355_v42, %v362_v47 }
 0x34e   :  { %v367_v49 = vmul.f32 1.442695, %v365_v48 }
 0x34f   :  { %v364_v50 = vpop.xlane.xlu0 %363 }
 0x350   :  { %v366_v51 = vsub.f32 %v358_v46, %v364_v50  ;;  %523 = vpow2.f32 %v367_v49 }
 0x352   :  { %v369_v52 = vmul.f32 1.442695, %v366_v51 }
 0x354   :  { %525 = vpow2.f32 %v369_v52 }
 0x35a   :  { %v524_v53 = vpop.eup %523 }
 0x35b   :  { %371 = vadd.xlane.f32.xlu1 %v524_v53 }
 0x35e   :  { %v526_v54 = vpop.eup %525 }
 0x35f   :  { %373 = vadd.xlane.f32.xlu1 %v526_v54 }
 0x3e8   :  { %v372_v55 = vpop.xlane.xlu1 %371 }
 0x3e9   :  { %527 = vlog2.f32 %v372_v55 }
 0x3ec   :  { %v374_v56 = vpop.xlane.xlu1 %373 }
 0x3ed   :  { %529 = vlog2.f32 %v374_v56 }
 0x3f3   :  { %v528_v57 = vpop.eup %527 }
 0x3f4   :  { %v376_v58 = vmul.f32 0.6931472, %v528_v57 }
 0x3f6   :  { %v379_v59 = vadd.f32 %v376_v58, %v362_v47 }
 0x3f7   :  { %v530_v60 = vpop.eup %529 }
 0x3f8   :  { %v381_v61 = vsub.f32 %v355_v42, %v379_v59  ;;  %v378_v62 = vmul.f32 0.6931472, %v530_v60 }
 0x3fa   :  { %383 = vst [vmem:[#allocation7] sm:$0xff] %v381_v61  ;;  %v380_v63 = vadd.f32 %v378_v62, %v364_v50 }
 0x3fc   :  { %v382_v0 = vsub.f32 %v358_v46, %v380_v63 }
 0x3fe   :  { %384 = vst [vmem:[#allocation7 + $0x8] sm:$0xff] %v382_v0 }
 0x3ff   :  { %586 = shalt.err (!%p583_p6)
}
 0x400   :  { %s587_s14 = scalar_lea.hbm %s737_s7, 256 }
 0x401   :  { %p588_p7 = scmp.ne.s32.totalorder %s737_s7, %s587_s14  ;;  %p591_p8 = scmp.lt.u32.totalorder %s587_s14, %s737_s7 }
 0x403   :  { %p593_p9 = pnand %p591_p8, %p588_p7 }
 0x405   :  { %596 = shalt.err (!%p593_p9)
}
 0x406   :  { %s610_s19 = smov 128   ;;  %s611_s20 = smov 8  }
 0x407   :  { %396 = dma.vmem_to_hbm [thread:$0]  %s391_s6, 256, %s737_s7, [#allocation4], %s610_s19, %s610_s19, %s611_s20  }
 0x408   :  { %601 = dma.done.wait [#allocation4], 256  }
 0x409   :  { %602 = vsyncadd [#allocation4], 4294967040 }
 0x40a   :  { %400 = vsyncpa [#allocation3], 1 }
 0x40b   :  { %401 = vsyncpa [#allocation6], 1 }
 0x40c   :  { %402 = vsyncpa [#allocation4], 1 }

</bundles_post_ra>
